<compile_context>
chip_gen: v7x
topology: tpu7x:2x2x1
jax: 0.10.0
libtpu: 0.0.40
codegen_flags: <defaults>
</compile_context>

<pallas_src>
import jax
import jax.numpy as jnp
from jax.experimental import pallas as pl
from jax.experimental.pallas import tpu as pltpu


def _channel_linear_kernel(x_ref, w_ref, b_ref, o_ref):
    # x_ref: (C_in, TN), w_ref: (C_out, C_in), b_ref: (C_out, 1),
    # o_ref: (C_out, TN).  Contract over C_in, keep the lane-dense slab.
    acc = jnp.dot(w_ref[...], x_ref[...], preferred_element_type=jnp.float32)
    o_ref[...] = (acc + b_ref[...]).astype(o_ref.dtype)


def _vmem_budget_bytes():
    """Per-TensorCore VMEM budget: ~3/4 of physical capacity.
    v5e/v6e (128 MiB) -> 96 MiB; v7x (64 MiB per TC) -> 48 MiB."""
    try:
        phys = int(pltpu.get_tpu_info().vmem_capacity_bytes)
    except Exception:
        phys = 64 << 20  # most conservative (v7x per-TC VMEM)
    return max(32 << 20, (phys * 3) // 4)


def _choose_lane_tile(N, C_in, C_out, itemsize, B, vmem_budget):
    """Pick a lane tile TN (multiple of 128 dividing N) so the *real*
    per-step VMEM footprint fits the budget:
      2 x (x block + out block)  (double-buffered pipeline)
      + f32 accumulator temp for the dot result
      + resident weight/bias (counted double-buffered, conservative)
      + headroom for compiler-internal scratch.
    Among fitting tiles, prefer an even grid with >= 4 steps (balanced
    across v7x's two TensorCores), then the largest slab (widest DMAs)."""
    assert N % 128 == 0
    per_col = 2 * (C_in + C_out) * itemsize + C_out * 4      # per lane column
    fixed = 2 * (C_out * C_in + C_out) * itemsize            # weight + bias
    headroom = 2 << 20
    avail = max(vmem_budget - fixed - headroom, per_col * 128)
    max_tn = max(128, (avail // per_col) // 128 * 128)
    hi = min(N, max_tn)
    candidates = [t for t in range(128, hi + 1, 128) if N % t == 0]
    if not candidates:
        candidates = [128]

    def score(t):
        steps = B * (N // t)
        return (steps % 2 == 0 and steps >= 4,   # even, enough steps for 2 TCs
                steps % 2 == 0,                  # at least an even split
                t)                               # then biggest DMA slabs

    return max(candidates, key=score)


def pallas_channel_linear(x3, weight, bias):
    """x3: (B, C_in, N) with N % 128 == 0; weight: (C_out, C_in) (PyTorch
    convention); bias: (C_out,).  Returns (B, C_out, N) = W @ x + b per batch."""
    B, C_in, N = x3.shape
    C_out, C_in_w = weight.shape
    assert C_in_w == C_in
    assert N % 128 == 0
    itemsize = x3.dtype.itemsize

    budget = _vmem_budget_bytes()
    tn = _choose_lane_tile(N, C_in, C_out, itemsize, B, budget)
    b2d = bias.reshape(C_out, 1)

    cost = pl.CostEstimate(
        flops=2 * B * C_out * C_in * N,
        transcendentals=0,
        bytes_accessed=itemsize * (B * N * (C_in + C_out) + C_out * C_in + C_out),
    )

    return pl.pallas_call(
        _channel_linear_kernel,
        out_shape=jax.ShapeDtypeStruct((B, C_out, N), x3.dtype),
        grid_spec=pltpu.PrefetchScalarGridSpec(
            num_scalar_prefetch=0,
            grid=(B, N // tn),
            in_specs=[
                # batch dim squeezed out of the kernel view
                pl.BlockSpec((None, C_in, tn), lambda b, j: (b, 0, j)),
                # weight & bias: constant index_map -> stays resident in VMEM
                pl.BlockSpec((C_out, C_in), lambda b, j: (0, 0)),
                pl.BlockSpec((C_out, 1), lambda b, j: (0, 0)),
            ],
            out_specs=pl.BlockSpec((None, C_out, tn), lambda b, j: (b, 0, j)),
        ),
        compiler_params=pltpu.CompilerParams(
            dimension_semantics=("parallel", "parallel"),
            vmem_limit_bytes=int(budget),
        ),
        cost_estimate=cost,
    )(x3, weight, b2d)


def to_time_sequence_forward(x, weight, bias):
    """ToTimeSequence(nn.Linear(C, C)).forward(x)

    x:      (B, C, F, H, W)   -- PyTorch NCFHW convention
    weight: (C, C)            -- nn.Linear weight (out, in), used as-is
    bias:   (C,)              -- nn.Linear bias
    returns (B, C, F, H, W)

    No transposes: the rearrange/pack/unpack of the original module are
    mathematically absorbed into a channel-contraction in the native layout.
    The lane axis (F*H*W) is padded up to a multiple of 128 so blocks stay
    bounded and output stores are unmasked full-width.
    """
    B, C, F, H, W = x.shape
    C_out = weight.shape[0]
    N = F * H * W
    N_pad = -(-N // 128) * 128
    x3 = x.reshape(B, C, N)
    if N_pad != N:
        x3 = jnp.pad(x3, ((0, 0), (0, 0), (0, N_pad - N)))
    o3 = pallas_channel_linear(x3, weight, bias)
    if N_pad != N:
        o3 = o3[:, :, :N]
    return o3.reshape(B, C_out, F, H, W)


if __name__ == "__main__":
    key = jax.random.PRNGKey(0)
    kx, kw, kb = jax.random.split(key, 3)

    # Main test: N = F*H*W = 512 (multiple of 128), grid splits evenly.
    B, C, F, H, W = 2, 32, 8, 8, 8
    x = jax.random.normal(kx, (B, C, F, H, W), dtype=jnp.float32)
    # Deterministic nn.Linear(C, C) parameters (PyTorch shape conventions).
    weight = jax.random.normal(kw, (C, C), dtype=jnp.float32) * 0.02
    bias = jax.random.normal(kb, (C,), dtype=jnp.float32) * 0.02

    def ref_fwd(xi, w, b):
        # Reference following the original module's semantics exactly:
        # rearrange -> per-token Linear (y = x @ W^T + b) -> rearrange back.
        xr = jnp.transpose(xi, (0, 3, 4, 2, 1))                # b h w f c
        r = jnp.einsum("bhwfc,oc->bhwfo", xr, w) + b           # nn.Linear
        return jnp.transpose(r, (0, 4, 3, 1, 2))               # b c f h w

    out = jax.block_until_ready(to_time_sequence_forward(x, weight, bias))
    assert out.shape == (B, C, F, H, W)
    assert jnp.allclose(out, ref_fwd(x, weight, bias), atol=1e-4, rtol=1e-4)

    # Second test exercises the N % 128 != 0 padding path (N = 105 -> 128).
    B2, F2, H2, W2 = 1, 3, 5, 7
    x2 = jax.random.normal(kx, (B2, C, F2, H2, W2), dtype=jnp.float32)
    out2 = jax.block_until_ready(to_time_sequence_forward(x2, weight, bias))
    assert out2.shape == (B2, C, F2, H2, W2)
    assert jnp.allclose(out2, ref_fwd(x2, weight, bias), atol=1e-4, rtol=1e-4)

    print("KERNEL_OK")
</pallas_src>

<mosaic_0001>
module attributes {stable_mosaic.version = 11 : i64} {
  func.func @_channel_linear_kernel(%arg0: i32, %arg1: i32, %arg2: memref<1x32x256xf32, #tpu.memory_space<vmem>>, %arg3: memref<32x32xf32, #tpu.memory_space<vmem>>, %arg4: memref<32x1xf32, #tpu.memory_space<vmem>>, %arg5: memref<1x32x256xf32, #tpu.memory_space<vmem>>) attributes {dimension_semantics = [#tpu.dimension_semantics<parallel>, #tpu.dimension_semantics<parallel>], iteration_bounds = array<i64: 2, 2>, scalar_prefetch = 0 : i64, scratch_operands = 0 : i64, tpu.core_type = #tpu.core_type<tc>, window_params = [{transform_indices = @transform_0, window_bounds = array<i64: 1, 32, 256>}, {pipeline_mode = #tpu.pipeline_mode<synchronous>, transform_indices = @transform_1, window_bounds = array<i64: 32, 32>}, {pipeline_mode = #tpu.pipeline_mode<synchronous>, transform_indices = @transform_2, window_bounds = array<i64: 32, 1>}, {transform_indices = @transform_3, window_bounds = array<i64: 1, 32, 256>}]} {
    %c0 = arith.constant 0 : index
    %c0_0 = arith.constant 0 : index
    %0 = vector.load %arg3[%c0, %c0_0] : memref<32x32xf32, #tpu.memory_space<vmem>>, vector<32x32xf32>
    %c0_1 = arith.constant 0 : index
    %c0_2 = arith.constant 0 : index
    %c0_3 = arith.constant 0 : index
    %1 = vector.load %arg2[%c0_1, %c0_2, %c0_3] : memref<1x32x256xf32, #tpu.memory_space<vmem>>, vector<1x32x256xf32>
    %2 = vector.shape_cast %1 : vector<1x32x256xf32> to vector<32x256xf32>
    %cst = arith.constant dense<0.000000e+00> : vector<32x256xf32>
    %3 = tpu.matmul %0, %2, %cst {dimension_numbers = #tpu.dot_dimension_numbers<[1], [0], [0], [1], [0, 0, 1, 1], [], []>} : vector<32x32xf32>, vector<32x256xf32>, vector<32x256xf32> -> vector<32x256xf32>
    %c0_4 = arith.constant 0 : index
    %c0_5 = arith.constant 0 : index
    %4 = vector.load %arg4[%c0_4, %c0_5] : memref<32x1xf32, #tpu.memory_space<vmem>>, vector<32x1xf32>
    %5 = vector.broadcast %4 : vector<32x1xf32> to vector<32x256xf32>
    %6 = arith.addf %3, %5 : vector<32x256xf32>
    %c0_6 = arith.constant 0 : index
    %c0_7 = arith.constant 0 : index
    %c0_8 = arith.constant 0 : index
    %7 = vector.load %arg5[%c0_6, %c0_7, %c0_8] : memref<1x32x256xf32, #tpu.memory_space<vmem>>, vector<1x32x256xf32>
    %8 = vector.shape_cast %7 : vector<1x32x256xf32> to vector<32x256xf32>
    %9 = vector.shape_cast %6 : vector<32x256xf32> to vector<1x32x256xf32>
    tpu.vector_store %arg5[%c0_6, %c0_7, %c0_8], %9 {strides = array<i32>} : memref<1x32x256xf32, #tpu.memory_space<vmem>>, vector<1x32x256xf32>,
    return
  }
  func.func @transform_0(%arg0: i32, %arg1: i32) -> (i32, i32, i32) {
    %c0_i32 = arith.constant 0 : i32
    %c0_i32_0 = arith.constant 0 : i32
    return %arg0, %c0_i32, %arg1 : i32, i32, i32
  }
  func.func @transform_1(%arg0: i32, %arg1: i32) -> (i32, i32) {
    %c0_i32 = arith.constant 0 : i32
    %c0_i32_0 = arith.constant 0 : i32
    %c0_i32_1 = arith.constant 0 : i32
    return %c0_i32, %c0_i32_0 : i32, i32
  }
  func.func @transform_2(%arg0: i32, %arg1: i32) -> (i32, i32) {
    %c0_i32 = arith.constant 0 : i32
    %c0_i32_0 = arith.constant 0 : i32
    %c0_i32_1 = arith.constant 0 : i32
    return %c0_i32, %c0_i32_0 : i32, i32
  }
  func.func @transform_3(%arg0: i32, %arg1: i32) -> (i32, i32, i32) {
    %c0_i32 = arith.constant 0 : i32
    %c0_i32_0 = arith.constant 0 : i32
    return %arg0, %c0_i32, %arg1 : i32, i32, i32
  }
}

</mosaic_0001>

<bundles_post_ra>
// kernel: tpu_custom_call.1
= control target key start
LH: loop header
LB: loop body
LE: loop exit
PB: predicated region body
PF: predicated region fallthrough
CT: control target
= control target key end

     0   :  { %8 = vsyncpa [#allocation3], 0  ;;  %s967_s0 = inlined_call_operand.hbm [shape: f32[2,32,512], index: 0, kind: input, shape index: {}]   ;;  %s968_s1 = inlined_call_operand.vmem [shape: f32[32,32], index: 1, kind: input, shape index: {}]   ;;  %s969_s2 = inlined_call_operand.vmem [shape: f32[32,1], index: 2, kind: input, shape index: {}]   ;;  %s970_s3 = inlined_call_operand.hbm [shape: f32[2,32,512], index: 3, kind: output, shape index: {}]  }
   0x1   :  { %10 = vsyncpa [#allocation3 + $0x1], 0 }
   0x2   :  { %11 = vsyncpa [#allocation4], 0 }
   0x3   :  { %13 = vsyncpa [#allocation4 + $0x1], 0  ;;  %s742_s12 = smov 0   ;;  %s744_s13 = smov 0  }
   0x4   :  { %s746_s14 = smov 0   ;;  %s748_s15 = smov 0  }
   0x5   :  { %s750_s16 = smov 0   ;;  %s752_s17 = smov 0  }
   0x6   :  { %s754_s18 = smov 0   ;;  %s756_s19 = smov 0  }
   0x7 LB: > { %s461_s20 = sadd.s32 4294967295, %s710_s19   ;;  %s462_s21 = sadd.s32 4294967294, %s710_s19   ;;  %s710_s19 = sphi %s756_s19, %s19_s19   ;;  %s706_s18 = sphi %s754_s18, %s986_s18   ;;  %s702_s17 = sphi %s752_s17, %s985_s17   ;;  %s698_s16 = sphi %s750_s16, %s984_s16   ;;  %s694_s15 = sphi %s748_s15, %s983_s15   ;;  %s690_s14 = sphi %s746_s14, %s982_s14   ;;  %s686_s13 = sphi %s744_s13, %s981_s13   ;;  %s682_s12 = sphi %s742_s12, %s980_s12  }
   0x8   : > { %s28_s22 = sadd.s32 1, %s702_s17  ;;  %s31_s23 = sadd.s32 1, %s706_s18 }
   0x9   : > { %p29_p0 = scmp.ge.s32.totalorder %s28_s22, 2  ;;  %s40_s24 = sadd.s32 1, %s690_s14 }
   0xa   : > { %p47_p1 = scmp.ne.s32.totalorder %s690_s14, %s686_s13  ;;  %p48_p2 = scmp.eq.s32.totalorder %s710_s19, 0 }
   0xb   : > { %s988_s22 = smov (%p29_p0, %s28_s22), 0  ;;  %s990_s23 = smov (!%p29_p0, %s31_s23), %s706_s18 }
   0xc   : > { %s36_s25 = ssub.s32 %s702_s17, %s988_s22  ;;  %p795_p3 = por %p48_p2, %p47_p1 }
   0xd   : > { %p33_p4 = scmp.ge.s32.totalorder %s990_s23, 2  ;;  %p53_p5 = scmp.ne.s32.totalorder %s686_s13, %s682_s12 }
   0xe   : > { %p54_p6 = scmp.eq.s32.totalorder %s461_s20, 0  ;;  %p121_p7 = scmp.eq.s32.totalorder %s461_s20, 3 }
   0xf   : > { %s992_s23 = smov (%p33_p4, %s990_s23), 0  ;;  %p127_p10 = scmp.eq.s32.totalorder %s462_s21, 3 }
  0x10   : > { %p803_p8 = por %p54_p6, %p53_p5  ;;  %p807_p9 = por %p121_p7, %p47_p1 }
  0x11   : > { %s35_s29 = ssub.s32 %s706_s18, %s992_s23  ;;  %p813_p12 = por %p127_p10, %p53_p5 }
  0x12   : > { %s974_s28 = scalar_select %p807_p9, 1, 0 }
  0x13   : > { %s37_s30 = sor.u32 %s36_s25, %s35_s29  ;;  %p506_p13 = scmp.lt.s32.totalorder %s710_s19, 4 }
  0x14   : > { %p38_p11 = scmp.eq.s32.totalorder %s37_s30, 0  ;;  %s153_s5 = sand.u32 1, %s690_s14  }
  0x15   : > { %s975_s4 = scalar_select %p813_p12, 1, 0 }
  0x16   : > { %s820_s6 = scalar_select %p38_p11, %s690_s14, %s40_s24  }
  0x17   : > { %s465_s7 = sshll.u32 %s153_s5, 6  ;;  %s466_s8 = sshll.u32 %s702_s17, 1 }
  0x18   : > { %s467_s9 = sshll.u32 %s706_s18, 4  ;;  %s157_s10 = scalar_lea.vmem [#allocation2], %s465_s7 }
  0x19   : > { %s166_s11 = sshll.u32 %s157_s10, 4  ;;  %s163_s20 = sadd.s32 %s467_s9, %s466_s8  ;;  %s824_s11 = int_to_ptr.vmem [resolvable:$true] %s166_s11 }
  0x1a   : > { %s468_s21 = sshll.u32 %s163_s20, 7  ;;  %p828_p0 = pnand %p506_p13, %p795_p3 }
  0x1b   : > { %s835_s24 = scalar_lea.hbm %s967_s0, %s468_s21  ;;  %s838_s7 = scalar_lea.sflag [#allocation3], %s153_s5 }
  0x1c   : > { %s582_s8 = scalar_lea.hbm %s835_s24, 1024  ;;  %p584_p3 = pneg %p828_p0 }
  0x1d   : > { %p583_p2 = scmp.ne.s32.totalorder %s835_s24, %s582_s8  ;;  %s587_s10 = scalar_lea.hbm %s967_s0, 4096 }
  0x1e   : > { %p588_p6 = scmp.lt.u32.totalorder %s835_s24, %s967_s0  ;;  %p589_p7 = scmp.lt.u32.totalorder %s587_s10, %s582_s8 }
  0x1f   : > { %p585_p4 = pnand %p584_p3, %p583_p2  ;;  %p591_p11 = scmp.lt.u32.totalorder %s582_s8, %s835_s24 }
  0x20   : > { %p590_p10 = por %p589_p7, %p588_p6 }
  0x21   : > { %p586_p5 = pneg %p585_p4 }
  0x22   : > { %p592_p13 = por %p591_p11, %p590_p10 }
  0x24   : > { %p593_p1 = pnand %p592_p13, %p586_p5 }
  0x26   : > { %596 = shalt.err (!%p593_p1)
}
  0x27   : > { %s597_s5 = scalar_lea.vmem %s824_s11, 1024  ;;  %s712_s29 = smov [#allocation2]  }
  0x28   : > { %p598_p2 = scmp.ne.s32.totalorder %s824_s11, %s597_s5  ;;  %s602_s30 = sshll.u32 %s712_s29, 4  ;;  %s603_s30 = int_to_ptr.vmem [resolvable:$false] %s602_s30 }
  0x29   : > { %s604_s26 = scalar_lea.vmem %s603_s30, 2048  ;;  %p605_p9 = scmp.lt.s32.totalorder %s824_s11, %s603_s30 }
  0x2a   : > { %p600_p4 = pnand %p598_p2, %p584_p3  ;;  %p606_p6 = scmp.lt.s32.totalorder %s604_s26, %s597_s5 }
  0x2c   : > { %p601_p12 = pneg %p600_p4  ;;  %p607_p7 = por %p606_p6, %p605_p9 }
  0x2e   : > { %p608_p10 = pnand %p607_p7, %p601_p12 }
  0x30   : > { %611 = shalt.err (!%p608_p10)
}
  0x31   : > { %s713_s8 = smov 512   ;;  %s714_s9 = smov 256  }
  0x32   : > { %s715_s10 = smov 16   ;;  %p174_p1 = scmp.lt.s32.totalorder %s710_s19, 5 }
  0x33   : > { %501 = dma.hbm_to_vmem [thread:$0]  (!%p828_p0), %s835_s24, 1024, %s824_s11, %s838_s7, %s713_s8, %s714_s9, %s715_s10  }
  0x34   : > { %p977_p3 = scmp.ge.s32.totalorder %s710_s19, 1 }
  0x36   : > { %p175_p5 = pnand %p977_p3, %p174_p1 }
  0x37   : > { %s870_s20 = sand.u32 (!%p175_p5), 1, %s686_s13  }
  0x38   : > { %178 = sbr.rel (%p175_p5) target bundleno = 310 (0x136), region = 32  ;;  %s470_s21 = sshll.u32 (!%p175_p5), %s870_s20, 6 }
  0x39   : > { %s181_s5 = scalar_lea.sflag (!%p175_p5), [#allocation3], %s870_s20  ;;  %s184_s29 = scalar_lea.vmem (!%p175_p5), [#allocation2], %s470_s21 }
  0x3f   : > { %673 = dma.done.wait (%p803_p8), %s181_s5, 1024  }
  0x40   : > { %675 = vsyncadd (%p803_p8), %s181_s5, 4294966272  ;;  %v716_v0 = vmov 0.0   ;;  %v717_v1 = vmov 0   ;;  %v214_v2 = vld [vmem:[%s184_s29 + $0x8] sm:$0xff]  ;;  %v216_v3 = vld [vmem:[%s184_s29 + $0x18] sm:$0xff]  ;;  %vm245_vm0 = vcmask 261120  }
  0x41   : > { %322 = vmatprep.mubr.f32.mxu0 %v716_v0  ;;  %334 = vmatprep.mubr.f32.mxu1 %v716_v0  ;;  %v213_v4 = vld [vmem:[%s184_s29] sm:$0xff]  ;;  %v482_v5 = vpack.c.bf16 %v216_v3, %v214_v2  ;;  %v215_v6 = vld [vmem:[%s184_s29 + $0x10] sm:$0xff]  ;;  %v218_v7 = vld [vmem:[%s184_s29 + $0x28] sm:$0xff]  ;;  %s477_s7 = sshll.u32 %s694_s15, 1  ;;  %s478_s30 = sshll.u32 %s698_s16, 4 }
  0x42   : > { %581 = vset.pattern.permute.xlu1 %v717_v1  ;;  %580 = vset.pattern.permute.xlu0 %v717_v1  ;;  %v220_v8 = vld [vmem:[%s184_s29 + $0x38] sm:$0xff]  ;;  %v484_v9 = vpack.c.bf16 %v215_v6, %v213_v4  ;;  %v217_v11 = vld [vmem:[%s184_s29 + $0x20] sm:$0xff]  ;;  %v219_v12 = vld [vmem:[%s184_s29 + $0x30] sm:$0xff]  ;;  %s368_s26 = sadd.s32 %s478_s30, %s477_s7  ;;  %s206_s8 = scalar_lea.vmem [#allocation5], %s470_s21 }
  0x43   : > { %v486_v10 = vpack.c.bf16 %v220_v8, %v218_v7  ;;  %483 = vmatprep.subr.bf16.mxu0 %v482_v5  ;;  %490 = vmatprep.subr.bf16.mxu1 %v482_v5  ;;  %v488_v13 = vpack.c.bf16 %v219_v12, %v217_v11  ;;  %v223_v14 = vld [vmem:[%s969_s2 + $0x10] sm:$0xff]  ;;  %v221_v15 = vld [vmem:[%s969_s2] sm:$0xff]  ;;  %v224_v16 = vld [vmem:[%s969_s2 + $0x18] sm:$0xff]  ;;  %s371_s9 = sshll.u32 %s206_s8, 4  ;;  %s479_s10 = sshll.u32 %s368_s26, 7  ;;  %s908_s9 = int_to_ptr.vmem [resolvable:$true] %s371_s9 }
  0x44   : > { %485 = vmatpush1.bf16.msra.mxu0 %v484_v9  ;;  %492 = vmatpush1.bf16.msra.mxu1 %v484_v9  ;;  %v222_v17 = vld [vmem:[%s969_s2 + $0x8] sm:$0xff]  ;;  %v209_v18 = vld [vmem:[%s968_s1] sm:$0xff]  ;;  %v211_v19 = vld [vmem:[%s968_s1 + $0x10] sm:$0xff]  ;;  %s913_s21 = scalar_lea.hbm %s970_s3, %s479_s10  ;;  %s356_s5 = scalar_lea.sflag [#allocation4], %s870_s20 }
  0x45   : > { %487 = vmatprep.subr.bf16.mxu0 %v486_v10  ;;  %491 = vmatprep.subr.bf16.mxu1 %v486_v10  ;;  %v210_v20 = vld [vmem:[%s968_s1 + $0x8] sm:$0xff]  ;;  %v212_v21 = vld [vmem:[%s968_s1 + $0x18] sm:$0xff]  ;;  %s612_s29 = scalar_lea.vmem %s908_s9, 1024  ;;  %p978_p9 = scmp.ne.s32.totalorder %s974_s28, 0 }
  0x46   : > { %237 = vperm.xlu1 %581, %v223_v14   ;;  %227 = vperm.xlu0 %580, %v221_v15   ;;  %p613_p8 = scmp.ne.s32.totalorder %s908_s9, %s612_s29  ;;  %s718_s27 = smov [#allocation5]  }
  0x47   : > { %s616_s11 = sshll.u32 %s718_s27, 4  ;;  %s617_s11 = int_to_ptr.vmem [resolvable:$false] %s616_s11 }
  0x48   : > { %489 = vmatpush1.bf16.msra.mxu0 %v488_v13  ;;  %493 = vmatpush1.bf16.msra.mxu1 %v488_v13  ;;  %p614_p12 = pnand %p613_p8, %p978_p9  ;;  %s618_s25 = scalar_lea.vmem %s617_s11, 2048 }
  0x49   : > { %p619_p11 = scmp.lt.s32.totalorder %s908_s9, %s617_s11  ;;  %p620_p13 = scmp.lt.s32.totalorder %s618_s25, %s612_s29 }
  0x4a   : > { %242 = vperm.xlu1 %581, %v224_v16   ;;  %232 = vperm.xlu0 %580, %v222_v17   ;;  %p615_p0 = pneg %p614_p12 }
  0x4b   : > { %472 = vmatmul.mubr.msk.f32.vlgmr.msra.gmra.mrb[0].mxu0 %vm245_vm0, %v209_v18  ;;  %474 = vmatmul.mubr.msk.f32.vlgmr.msra.gmra.mrb[0].mxu1 %vm245_vm0, %v211_v19  ;;  %p621_p2 = por %p620_p13, %p619_p11 }
  0x4c   : > { %328 = vmatprep.mubr.f32.mxu0 %v716_v0  ;;  %340 = vmatprep.mubr.f32.mxu1 %v716_v0 }
  0x4d   : > { %p622_p4 = pnand %p621_p2, %p615_p0 }
  0x4f   : > { %473 = vmatmul.mubr.msk.f32.gmra.mrb[2].mxu0 %vm245_vm0, %v210_v20  ;;  %475 = vmatmul.mubr.msk.f32.gmra.mrb[2].mxu1 %vm245_vm0, %v212_v21 }
  0xc5   : > { %v238_v22 = vpop.permute.xlu1 %237  ;;  %v228_v23 = vpop.permute.xlu0 %227 }
  0xc9   : > { %v243_v32 = vpop.permute.xlu1 %242  ;;  %v233_v33 = vpop.permute.xlu0 %232 }
 0x11e   : > { %v324_v24 = vpop.f32.mrb[0].mxu0  ;;  %v336_v25 = vpop.f32.mrb[0].mxu1 }
 0x11f   : > { %v325_v26 = vadd.f32 %v324_v24, %v228_v23  ;;  %v337_v27 = vadd.f32 %v336_v25, %v238_v22  ;;  %v326_v28 = vpop.f32.mrb[1].mxu0  ;;  %v338_v29 = vpop.f32.mrb[1].mxu1 }
 0x120   : > { %v327_v30 = vadd.f32 %v326_v28, %v228_v23  ;;  %v339_v31 = vadd.f32 %v338_v29, %v238_v22 }
 0x121   : > { %347 = vst [vmem:[%s206_s8] sm:$0xff] %v325_v26  ;;  %351 = vst [vmem:[%s206_s8 + $0x20] sm:$0xff] %v337_v27 }
 0x122   : > { %348 = vst [vmem:[%s206_s8 + $0x8] sm:$0xff] %v327_v30  ;;  %352 = vst [vmem:[%s206_s8 + $0x28] sm:$0xff] %v339_v31  ;;  %v330_v34 = vpop.f32.mrb[2].mxu0  ;;  %v342_v35 = vpop.f32.mrb[2].mxu1 }
 0x123   : > { %v331_v36 = vadd.f32 %v330_v34, %v233_v33  ;;  %v343_v37 = vadd.f32 %v342_v35, %v243_v32  ;;  %v332_v38 = vpop.f32.mrb[3].mxu0  ;;  %v344_v39 = vpop.f32.mrb[3].mxu1 }
 0x124   : > { %v333_v40 = vadd.f32 %v332_v38, %v233_v33  ;;  %v345_v41 = vadd.f32 %v344_v39, %v243_v32 }
 0x125   : > { %349 = vst [vmem:[%s206_s8 + $0x10] sm:$0xff] %v331_v36  ;;  %353 = vst [vmem:[%s206_s8 + $0x30] sm:$0xff] %v343_v37 }
 0x126   : > { %350 = vst [vmem:[%s206_s8 + $0x18] sm:$0xff] %v333_v40  ;;  %354 = vst [vmem:[%s206_s8 + $0x38] sm:$0xff] %v345_v41 }
 0x127   : > { %625 = shalt.err (!%p622_p4)
}
 0x128   : > { %s626_s24 = scalar_lea.hbm %s913_s21, 1024  ;;  %s630_s26 = scalar_lea.hbm %s970_s3, 4096 }
 0x129   : > { %p627_p6 = scmp.ne.s32.totalorder %s913_s21, %s626_s24  ;;  %p631_p1 = scmp.lt.u32.totalorder %s913_s21, %s970_s3 }
 0x12a   : > { %p632_p3 = scmp.lt.u32.totalorder %s630_s26, %s626_s24  ;;  %p634_p8 = scmp.lt.u32.totalorder %s626_s24, %s913_s21 }
 0x12b   : > { %p628_p7 = pnand %p627_p6, %p978_p9 }
 0x12c   : > { %p633_p5 = por %p632_p3, %p631_p1 }
 0x12d   : > { %p629_p10 = pneg %p628_p7 }
 0x12e   : > { %p635_p12 = por %p634_p8, %p633_p5 }
 0x130   : > { %p636_p0 = pnand %p635_p12, %p629_p10 }
 0x132   : > { %639 = shalt.err (!%p636_p0)
}
 0x133   : > { %s719_s15 = smov 256   ;;  %s720_s16 = smov 512  }
 0x134   : > { %s721_s29 = smov 16  }
 0x135   : > { %496 = dma.vmem_to_hbm [thread:$0]  (%p978_p9), %s908_s9, 1024, %s913_s21, %s356_s5, %s719_s15, %s720_s16, %s721_s29  }
 0x136 PF: > { %p507_p11 = scmp.ge.s32.totalorder %s710_s19, 2  ;;  %s386_s27 = sand.u32 1, %s682_s12  }
 0x137   : > { %p979_p13 = scmp.ne.s32.totalorder %s975_s4, 0  ;;  %s387_s11 = scalar_lea.sflag [#allocation4], %s386_s27 }
 0x139   : > { %p503_p2 = pnand %p507_p11, %p979_p13 }
 0x13b   : > { %677 = dma.done.wait (!%p503_p2), %s387_s11, 1024  }
 0x13c   : > { %679 = vsyncadd (!%p503_p2), %s387_s11, 4294966272  ;;  %s19_s19 = sadd.s32 1, %s710_s19   ;;  %s980_s12 = smov %s686_s13 }
 0x13d   : > { %p16_p4 = scmp.ge.s32.totalorder %s19_s19, 6   ;;  %s981_s13 = smov %s690_s14 }
 0x13e   : > { %s982_s14 = smov %s820_s6  ;;  %s983_s15 = smov %s702_s17 }
 0x13f   : > { %s984_s16 = smov %s706_s18  ;;  %s985_s17 = smov %s988_s22 }
 0x140   : > { %s986_s18 = smov %s992_s23  ;;  %18 = sbr.rel (!%p16_p4) target bundleno = 7 (0x7), region = 77 }
 0x147   :  { %392 = vsyncpa [#allocation3], 1 }
 0x148   :  { %394 = vsyncpa [#allocation3 + $0x1], 1 }
 0x149   :  { %395 = vsyncpa [#allocation4], 1 }
 0x14a   :  { %397 = vsyncpa [#allocation4 + $0x1], 1 }

</bundles_post_ra>
